<compile_context>
chip_gen: v5e
topology: v5e:2x2
jax: 0.10.0
libtpu: 0.0.40
codegen_flags: <defaults>
</compile_context>

<pallas_src>
import functools

import jax
import jax.numpy as jnp
from jax.experimental import pallas as pl
from jax.experimental.pallas import tpu as pltpu


# ----------------------------------------------------------------------------- helpers
def _round_up(x, m):
    return ((x + m - 1) // m) * m


def _pad2(x, rows, cols):
    pr, pc = rows - x.shape[0], cols - x.shape[1]
    if pr == 0 and pc == 0:
        return x
    return jnp.pad(x, ((0, pr), (0, pc)))


def _pad1(v, n):
    p = n - v.shape[0]
    return v if p == 0 else jnp.pad(v, (0, p))


# ----------------------------------------------------------------------------- fused matmul kernel
# out = epilogue( prologue(A) @ B )
#   prologue: per-K-column scale/shift (+ReLU)  (BN->ReLU preceding a 1x1 conv / fc)
#   epilogue: per-N-column scale/shift (+ReLU)  (BN(+ReLU) / bias following a conv / fc)
# A and B arrive in bf16 (MXU rate + half the HBM bytes); accumulation is f32 in VMEM.
def _mm_kernel(*refs, has_pro, pro_relu, has_epi, epi_relu):
    it = iter(refs)
    a_ref = next(it)
    b_ref = next(it)
    psc_ref = psh_ref = esc_ref = esh_ref = None
    if has_pro:
        psc_ref = next(it)
        psh_ref = next(it)
    if has_epi:
        esc_ref = next(it)
        esh_ref = next(it)
    o_ref = next(it)
    acc_ref = next(it)

    @pl.when(pl.program_id(2) == 0)
    def _init():
        acc_ref[...] = jnp.zeros_like(acc_ref)

    a = a_ref[...]
    if has_pro:
        a = a.astype(jnp.float32) * psc_ref[...] + psh_ref[...]
        if pro_relu:
            a = jnp.maximum(a, 0.0)
        a = a.astype(jnp.bfloat16)
    acc_ref[...] += jnp.dot(a, b_ref[...], preferred_element_type=jnp.float32)

    @pl.when(pl.program_id(2) == pl.num_programs(2) - 1)
    def _store():
        y = acc_ref[...]
        if has_epi:
            y = y * esc_ref[...] + esh_ref[...]
            if epi_relu:
                y = jnp.maximum(y, 0.0)
        o_ref[...] = y.astype(o_ref.dtype)


def fused_matmul(a, b, pro=None, pro_relu=False, epi=None, epi_relu=False):
    """a: (M, K) f32, b: (K, N) f32 -> (M, N) f32 on the MXU, with optional fused
    per-K prologue affine(+relu) and per-N epilogue affine(+relu)."""
    M, K = a.shape
    K2, N = b.shape
    assert K == K2
    has_pro, has_epi = pro is not None, epi is not None

    tm = min(256, _round_up(M, 16))
    tk = min(512, _round_up(K, 128))
    Np = _round_up(N, 128)
    tn = 256 if (Np >= 256 and Np % 256 == 0) else 128
    Mp, Kp = _round_up(M, tm), _round_up(K, tk)

    ap = _pad2(a, Mp, Kp).astype(jnp.bfloat16)
    bp = _pad2(b, Kp, Np).astype(jnp.bfloat16)

    inputs = [ap, bp]
    in_specs = [
        pl.BlockSpec((tm, tk), lambda i, j, k: (i, k)),
        pl.BlockSpec((tk, tn), lambda i, j, k: (k, j)),
    ]
    if has_pro:
        inputs += [
            _pad1(pro[0].astype(jnp.float32), Kp).reshape(1, Kp),
            _pad1(pro[1].astype(jnp.float32), Kp).reshape(1, Kp),
        ]
        in_specs += [
            pl.BlockSpec((1, tk), lambda i, j, k: (0, k)),
            pl.BlockSpec((1, tk), lambda i, j, k: (0, k)),
        ]
    if has_epi:
        inputs += [
            _pad1(epi[0].astype(jnp.float32), Np).reshape(1, Np),
            _pad1(epi[1].astype(jnp.float32), Np).reshape(1, Np),
        ]
        in_specs += [
            pl.BlockSpec((1, tn), lambda i, j, k: (0, j)),
            pl.BlockSpec((1, tn), lambda i, j, k: (0, j)),
        ]

    kernel = functools.partial(_mm_kernel, has_pro=has_pro, pro_relu=pro_relu,
                               has_epi=has_epi, epi_relu=epi_relu)
    out = pl.pallas_call(
        kernel,
        out_shape=jax.ShapeDtypeStruct((Mp, Np), jnp.float32),
        grid_spec=pltpu.PrefetchScalarGridSpec(
            num_scalar_prefetch=0,
            grid=(Mp // tm, Np // tn, Kp // tk),
            in_specs=in_specs,
            out_specs=pl.BlockSpec((tm, tn), lambda i, j, k: (i, j)),
            scratch_shapes=[pltpu.VMEM((tm, tn), jnp.float32)],
        ),
        compiler_params=pltpu.CompilerParams(
            dimension_semantics=("parallel", "parallel", "arbitrary")
        ),
    )(*inputs)
    return out[:M, :N]


# ----------------------------------------------------------------------------- global average pool kernel
def _gap_kernel(x_ref, o_ref, acc_ref, *, inv_hw):
    @pl.when(pl.program_id(1) == 0)
    def _init():
        acc_ref[...] = jnp.zeros_like(acc_ref)

    # x block: (1, ts, Cp) -> sum the ts spatial rows; accumulate across the grid axis.
    acc_ref[...] += jnp.sum(x_ref[0], axis=0, keepdims=True)

    @pl.when(pl.program_id(1) == pl.num_programs(1) - 1)
    def _store():
        o_ref[...] = (acc_ref[...] * inv_hw)[None]


def global_avg_pool(x):
    """AdaptiveAvgPool2d((1,1)) == mean over H,W.  The H*W reduction runs as an
    'arbitrary' grid axis with a small VMEM accumulator (no window stacking, no
    transpose, fixed VMEM footprint independent of spatial size)."""
    N, H, W, C = x.shape
    HW = H * W
    Cp = _round_up(C, 128)
    ts = min(512, _round_up(HW, 8))
    HWp = _round_up(HW, ts)
    xr = x.reshape(N, HW, C)
    if HWp != HW or Cp != C:
        xr = jnp.pad(xr, ((0, 0), (0, HWp - HW), (0, Cp - C)))

    out = pl.pallas_call(
        functools.partial(_gap_kernel, inv_hw=1.0 / HW),
        out_shape=jax.ShapeDtypeStruct((N, 8, Cp), jnp.float32),
        grid_spec=pltpu.PrefetchScalarGridSpec(
            num_scalar_prefetch=0,
            grid=(N, HWp // ts),
            in_specs=[pl.BlockSpec((1, ts, Cp), lambda n, s: (n, s, 0))],
            out_specs=pl.BlockSpec((1, 8, Cp), lambda n, s: (n, 0, 0)),
            scratch_shapes=[pltpu.VMEM((8, Cp), jnp.float32)],
        ),
        compiler_params=pltpu.CompilerParams(
            dimension_semantics=("parallel", "arbitrary")
        ),
    )(xr)
    return out[:, 0, :C]


# ----------------------------------------------------------------------------- window reduce kernel (max / 2x2-avg pooling)
def _pool_kernel(x_ref, o_ref, *, op, window):
    acc = x_ref[0]
    for w in range(1, window):
        v = x_ref[w]
        acc = jnp.maximum(acc, v) if op == "max" else acc + v
    if op == "avg":
        acc = acc * (1.0 / window)
    o_ref[...] = acc


def window_reduce_pallas(x, op):
    """x: (W, M, C); reduce (max or mean) over window axis 0 -> (M, C). f32 math."""
    W, M, C = x.shape
    Cp = _round_up(C, 128)
    tm = min(256, _round_up(M, 8))
    Mp = _round_up(M, tm)
    pad_val = float("-inf") if op == "max" else 0.0
    if Mp != M or Cp != C:
        x = jnp.pad(x, ((0, 0), (0, Mp - M), (0, Cp - C)), constant_values=pad_val)

    out = pl.pallas_call(
        functools.partial(_pool_kernel, op=op, window=W),
        out_shape=jax.ShapeDtypeStruct((Mp, Cp), jnp.float32),
        grid=(Mp // tm,),
        in_specs=[pl.BlockSpec((W, tm, Cp), lambda i: (0, i, 0))],
        out_specs=pl.BlockSpec((tm, Cp), lambda i: (i, 0)),
        compiler_params=pltpu.CompilerParams(dimension_semantics=("parallel",)),
    )(x)
    return out[:M, :C]


# ----------------------------------------------------------------------------- layer wrappers (JAX glue)
def _bn_fold(p):
    """Eval-mode BatchNorm2d folded to per-channel (scale, shift)."""
    scale = p["gamma"] / jnp.sqrt(p["var"] + 1e-5)
    shift = p["beta"] - p["mean"] * scale
    return scale, shift


def conv2d_fused(x, w, stride=1, padding=0, pro=None, pro_relu=False,
                 epi=None, epi_relu=False):
    """x: (N, H, W, Cin); w: (KH, KW, Cin, Cout). Zero padding, no bias (DenseNet convs).
    pro/epi: optional (scale, shift) per-channel affines fused into the matmul."""
    N, H, W_, Cin = x.shape
    KH, KW, _, Cout = w.shape
    if KH == 1 and KW == 1 and stride == 1 and padding == 0:
        # 1x1 conv: no im2col at all -- A is just a reshape of the activation.
        OH, OW = H, W_
        a = x.reshape(N * H * W_, Cin)
    else:
        # prologue BN would corrupt the conv's zero padding -> only allowed for 1x1 convs.
        assert pro is None
        xp = jnp.pad(x, ((0, 0), (padding, padding), (padding, padding), (0, 0)))
        OH = (H + 2 * padding - KH) // stride + 1
        OW = (W_ + 2 * padding - KW) // stride + 1
        cols = []
        for kh in range(KH):
            for kw in range(KW):
                cols.append(
                    xp[:, kh:kh + (OH - 1) * stride + 1:stride,
                          kw:kw + (OW - 1) * stride + 1:stride, :]
                )
        a = jnp.concatenate(cols, axis=-1).reshape(N * OH * OW, KH * KW * Cin)
    b = w.reshape(KH * KW * Cin, Cout)
    y = fused_matmul(a, b, pro=pro, pro_relu=pro_relu, epi=epi, epi_relu=epi_relu)
    return y.reshape(N, OH, OW, Cout)


def max_pool_3x3_s2_p1(x):
    N, H, W, C = x.shape
    xp = jnp.pad(x, ((0, 0), (1, 1), (1, 1), (0, 0)), constant_values=float("-inf"))
    OH = (H + 2 - 3) // 2 + 1
    OW = (W + 2 - 3) // 2 + 1
    wins = []
    for kh in range(3):
        for kw in range(3):
            wins.append(xp[:, kh:kh + 2 * (OH - 1) + 1:2, kw:kw + 2 * (OW - 1) + 1:2, :])
    stacked = jnp.stack(wins, axis=0).reshape(9, N * OH * OW, C)
    y = window_reduce_pallas(stacked, op="max")
    return y.reshape(N, OH, OW, C)


def avg_pool_2x2_s2(x):
    N, H, W, C = x.shape
    OH, OW = H // 2, W // 2
    wins = []
    for kh in range(2):
        for kw in range(2):
            wins.append(x[:, kh::2, kw::2, :][:, :OH, :OW, :])
    stacked = jnp.stack(wins, axis=0).reshape(4, N * OH * OW, C)
    y = window_reduce_pallas(stacked, op="avg")
    return y.reshape(N, OH, OW, C)


# ----------------------------------------------------------------------------- parameter init (synthetic, deterministic)
class KeyGen:
    def __init__(self, seed):
        self._key = jax.random.PRNGKey(seed)
        self._i = 0

    def __call__(self):
        self._i += 1
        return jax.random.fold_in(self._key, self._i)


def _conv_w(kg, kh, kw, cin, cout):
    std = (2.0 / (kh * kw * cin)) ** 0.5
    return jax.random.normal(kg(), (kh, kw, cin, cout), jnp.float32) * std


def _bn_p(kg, c):
    return {
        "gamma": jax.random.uniform(kg(), (c,), jnp.float32, 0.7, 1.3),
        "beta": jax.random.normal(kg(), (c,), jnp.float32) * 0.1,
        "mean": jax.random.normal(kg(), (c,), jnp.float32) * 0.1,
        "var": jax.random.uniform(kg(), (c,), jnp.float32, 0.5, 1.5),
    }


def init_densenet_params(seed=0, growth=8, block_config=(2, 2, 2, 2),
                         num_init=16, bn_size=4, feature_dim=1024):
    kg = KeyGen(seed)
    params = {"conv0": _conv_w(kg, 7, 7, 3, num_init), "norm0": _bn_p(kg, num_init)}
    c = num_init
    blocks, transitions = [], []
    for bi, nlayers in enumerate(block_config):
        layers = []
        for _ in range(nlayers):
            layers.append({
                "norm1": _bn_p(kg, c),
                "conv1": _conv_w(kg, 1, 1, c, bn_size * growth),
                "norm2": _bn_p(kg, bn_size * growth),
                "conv2": _conv_w(kg, 3, 3, bn_size * growth, growth),
            })
            c += growth
        blocks.append(layers)
        if bi != len(block_config) - 1:
            cout = c // 2
            transitions.append({"norm": _bn_p(kg, c), "conv": _conv_w(kg, 1, 1, c, cout)})
            c = cout
    params["blocks"] = blocks
    params["transitions"] = transitions
    params["norm5"] = _bn_p(kg, c)
    bound = 1.0 / (c ** 0.5)
    params["fc_w"] = jax.random.uniform(kg(), (c, feature_dim), jnp.float32, -bound, bound)
    params["fc_b"] = jax.random.uniform(kg(), (feature_dim,), jnp.float32, -bound, bound)
    params["feature_dim"] = feature_dim
    return params


# ----------------------------------------------------------------------------- forward pass
def _dense_layer(x, p):
    # torchvision _DenseLayer: norm1 -> relu -> conv1(1x1) -> norm2 -> relu -> conv2(3x3)
    # norm1+relu fused as conv1's prologue; norm2+relu fused as conv1's epilogue.
    y = conv2d_fused(x, p["conv1"], stride=1, padding=0,
                     pro=_bn_fold(p["norm1"]), pro_relu=True,
                     epi=_bn_fold(p["norm2"]), epi_relu=True)
    y = conv2d_fused(y, p["conv2"], stride=1, padding=1)
    return y


def _dense_block(x, layers):
    feats = x
    for lp in layers:
        new = _dense_layer(feats, lp)
        feats = jnp.concatenate([feats, new], axis=-1)
    return feats


def _transition(x, p):
    # norm -> relu -> conv(1x1) -> avgpool; norm+relu fused as the conv prologue.
    y = conv2d_fused(x, p["conv"], stride=1, padding=0,
                     pro=_bn_fold(p["norm"]), pro_relu=True)
    return avg_pool_2x2_s2(y)


def densenet_feature_extractor_forward(x_nchw, params):
    # PyTorch NCHW input -> NHWC for the TPU kernels.
    x = jnp.transpose(x_nchw, (0, 2, 3, 1)).astype(jnp.float32)

    # Stem: conv7x7/2 with norm0+ReLU fused as epilogue, then maxpool3x3/2.
    x = conv2d_fused(x, params["conv0"], stride=2, padding=3,
                     epi=_bn_fold(params["norm0"]), epi_relu=True)
    x = max_pool_3x3_s2_p1(x)

    # Dense blocks + transitions.
    for bi, block in enumerate(params["blocks"]):
        x = _dense_block(x, block)
        if bi < len(params["blocks"]) - 1:
            x = _transition(x, params["transitions"][bi])

    # features end with norm5 (no ReLU -- the module pools base_model.features output
    # directly).  norm5 is a per-channel affine, so it commutes exactly with the global
    # average pool; fuse it as the fc matmul prologue and the fc bias as its epilogue.
    pooled = global_avg_pool(x)                                        # (N, C)
    fd = params["feature_dim"]
    y = fused_matmul(pooled, params["fc_w"],
                     pro=_bn_fold(params["norm5"]), pro_relu=False,
                     epi=(jnp.ones((fd,), jnp.float32), params["fc_b"]),
                     epi_relu=False)                                   # (N, feature_dim)
    return y


# ----------------------------------------------------------------------------- main
if __name__ == "__main__":
    key = jax.random.PRNGKey(0)
    # Small input consistent with the module's forward: NCHW, 3 channels.
    x = jax.random.normal(key, (2, 3, 64, 64), dtype=jnp.float32)

    params = init_densenet_params(seed=0, growth=8, block_config=(2, 2, 2, 2),
                                  num_init=16, bn_size=4, feature_dim=1024)

    out = densenet_feature_extractor_forward(x, params)
    out = jax.block_until_ready(out)

    assert out.shape == (2, 1024), out.shape
    assert bool(jnp.all(jnp.isfinite(out)))
    print("KERNEL_OK")
</pallas_src>

<mosaic_0001>
module attributes {stable_mosaic.version = 11 : i64} {
  func.func @_mm_kernel(%arg0: i32, %arg1: i32, %arg2: i32, %arg3: memref<256x256xbf16, #tpu.memory_space<vmem>>, %arg4: memref<256x128xbf16, #tpu.memory_space<vmem>>, %arg5: memref<1x128xf32, #tpu.memory_space<vmem>>, %arg6: memref<1x128xf32, #tpu.memory_space<vmem>>, %arg7: memref<256x128xf32, #tpu.memory_space<vmem>>, %arg8: memref<256x128xf32, #tpu.memory_space<vmem>>) attributes {dimension_semantics = [#tpu.dimension_semantics<parallel>, #tpu.dimension_semantics<parallel>, #tpu.dimension_semantics<arbitrary>], iteration_bounds = array<i64: 8, 1, 1>, scalar_prefetch = 0 : i64, scratch_operands = 1 : i64, tpu.core_type = #tpu.core_type<tc>, window_params = [{transform_indices = @transform_0, window_bounds = array<i64: 256, 256>}, {transform_indices = @transform_1, window_bounds = array<i64: 256, 128>}, {transform_indices = @transform_2, window_bounds = array<i64: 1, 128>}, {transform_indices = @transform_3, window_bounds = array<i64: 1, 128>}, {transform_indices = @transform_4, window_bounds = array<i64: 256, 128>}]} {
    %c0_i32 = arith.constant 0 : i32
    %0 = arith.cmpi eq, %arg2, %c0_i32 : i32
    %1 = arith.extui %0 : i1 to i32
    %c0_i32_0 = arith.constant 0 : i32
    %2 = arith.cmpi ne, %1, %c0_i32_0 : i32
    scf.if %2 {
      %cst_10 = arith.constant 0.000000e+00 : f32
      %12 = vector.broadcast %cst_10 : f32 to vector<256x128xf32>
      %c0_11 = arith.constant 0 : index
      %c0_12 = arith.constant 0 : index
      %13 = vector.load %arg8[%c0_11, %c0_12] : memref<256x128xf32, #tpu.memory_space<vmem>>, vector<256x128xf32>
      tpu.vector_store %arg8[%c0_11, %c0_12], %12 {strides = array<i32>} : memref<256x128xf32, #tpu.memory_space<vmem>>, vector<256x128xf32>,
    } else {
    }
    %c0 = arith.constant 0 : index
    %c0_1 = arith.constant 0 : index
    %3 = vector.load %arg3[%c0, %c0_1] : memref<256x256xbf16, #tpu.memory_space<vmem>>, vector<256x256xbf16>
    %c0_2 = arith.constant 0 : index
    %c0_3 = arith.constant 0 : index
    %4 = vector.load %arg8[%c0_2, %c0_3] : memref<256x128xf32, #tpu.memory_space<vmem>>, vector<256x128xf32>
    %c0_4 = arith.constant 0 : index
    %c0_5 = arith.constant 0 : index
    %5 = vector.load %arg4[%c0_4, %c0_5] : memref<256x128xbf16, #tpu.memory_space<vmem>>, vector<256x128xbf16>
    %cst = arith.constant dense<0.000000e+00> : vector<256x128xf32>
    %6 = tpu.matmul %3, %5, %cst {dimension_numbers = #tpu.dot_dimension_numbers<[1], [0], [0], [1], [0, 0, 1, 1], [], []>} : vector<256x256xbf16>, vector<256x128xbf16>, vector<256x128xf32> -> vector<256x128xf32>
    %7 = arith.addf %4, %6 : vector<256x128xf32>
    %c0_6 = arith.constant 0 : index
    %c0_7 = arith.constant 0 : index
    %8 = vector.load %arg8[%c0_6, %c0_7] : memref<256x128xf32, #tpu.memory_space<vmem>>, vector<256x128xf32>
    tpu.vector_store %arg8[%c0_6, %c0_7], %7 {strides = array<i32>} : memref<256x128xf32, #tpu.memory_space<vmem>>, vector<256x128xf32>,
    %c0_i32_8 = arith.constant 0 : i32
    %9 = arith.cmpi eq, %arg2, %c0_i32_8 : i32
    %10 = arith.extui %9 : i1 to i32
    %c0_i32_9 = arith.constant 0 : i32
    %11 = arith.cmpi ne, %10, %c0_i32_9 : i32
    scf.if %11 {
      %c0_10 = arith.constant 0 : index
      %c0_11 = arith.constant 0 : index
      %12 = vector.load %arg8[%c0_10, %c0_11] : memref<256x128xf32, #tpu.memory_space<vmem>>, vector<256x128xf32>
      %c0_12 = arith.constant 0 : index
      %c0_13 = arith.constant 0 : index
      %13 = vector.load %arg5[%c0_12, %c0_13] : memref<1x128xf32, #tpu.memory_space<vmem>>, vector<1x128xf32>
      %14 = vector.broadcast %13 : vector<1x128xf32> to vector<256x128xf32>
      %15 = arith.mulf %12, %14 : vector<256x128xf32>
      %c0_14 = arith.constant 0 : index
      %c0_15 = arith.constant 0 : index
      %16 = vector.load %arg6[%c0_14, %c0_15] : memref<1x128xf32, #tpu.memory_space<vmem>>, vector<1x128xf32>
      %17 = vector.broadcast %16 : vector<1x128xf32> to vector<256x128xf32>
      %18 = arith.addf %15, %17 : vector<256x128xf32>
      %cst_16 = arith.constant 0.000000e+00 : f32
      %19 = vector.broadcast %cst_16 : f32 to vector<256x128xf32>
      %20 = arith.maximumf %18, %19 : vector<256x128xf32>
      %c0_17 = arith.constant 0 : index
      %c0_18 = arith.constant 0 : index
      %21 = vector.load %arg7[%c0_17, %c0_18] : memref<256x128xf32, #tpu.memory_space<vmem>>, vector<256x128xf32>
      tpu.vector_store %arg7[%c0_17, %c0_18], %20 {strides = array<i32>} : memref<256x128xf32, #tpu.memory_space<vmem>>, vector<256x128xf32>,
    } else {
    }
    return
  }
  func.func @transform_0(%arg0: i32, %arg1: i32, %arg2: i32) -> (i32, i32) {
    %c0_i32 = arith.constant 0 : i32
    return %arg0, %arg2 : i32, i32
  }
  func.func @transform_1(%arg0: i32, %arg1: i32, %arg2: i32) -> (i32, i32) {
    %c0_i32 = arith.constant 0 : i32
    return %arg2, %arg1 : i32, i32
  }
  func.func @transform_2(%arg0: i32, %arg1: i32, %arg2: i32) -> (i32, i32) {
    %c0_i32 = arith.constant 0 : i32
    %c0_i32_0 = arith.constant 0 : i32
    return %c0_i32, %arg1 : i32, i32
  }
  func.func @transform_3(%arg0: i32, %arg1: i32, %arg2: i32) -> (i32, i32) {
    %c0_i32 = arith.constant 0 : i32
    %c0_i32_0 = arith.constant 0 : i32
    return %c0_i32, %arg1 : i32, i32
  }
  func.func @transform_4(%arg0: i32, %arg1: i32, %arg2: i32) -> (i32, i32) {
    %c0_i32 = arith.constant 0 : i32
    return %arg0, %arg1 : i32, i32
  }
}

</mosaic_0001>

<bundles_post_ra>
// kernel: tpu_custom_call.1
= control target key start
LH: loop header
LB: loop body
LE: loop exit
PB: predicated region body
PF: predicated region fallthrough
CT: control target
= control target key end

     0   :  { %s2115_s0 = inlined_call_operand.hbm [shape: bf16[2048,256], index: 0, kind: input, shape index: {}]   ;;  %s2116_s1 = inlined_call_operand.hbm [shape: bf16[256,128], index: 1, kind: input, shape index: {}]   ;;  %s2117_s2 = inlined_call_operand.vmem [shape: f32[1,128], index: 2, kind: input, shape index: {}]   ;;  %s2118_s3 = inlined_call_operand.vmem [shape: f32[1,128], index: 3, kind: input, shape index: {}]   ;;  %s2119_s4 = inlined_call_operand.hbm [shape: f32[2048,128], index: 4, kind: output, shape index: {}]  }
   0x1   :  { %2121 = sst [smem:[#allocation13_spill]] %s2116_s1 }
   0x2   :  { %9 = vsyncpa [#allocation4], 0 }
   0x3   :  { %11 = vsyncpa [#allocation4 + $0x1], 0 }
   0x4   :  { %12 = vsyncpa [#allocation7], 0 }
   0x5   :  { %13 = vsyncpa [#allocation5], 0 }
   0x6   :  { %15 = vsyncpa [#allocation5 + $0x1], 0  ;;  %s1789_s15 = smov 0   ;;  %s1791_s16 = smov 0  }
   0x7   :  { %s1793_s17 = smov 0   ;;  %s1795_s18 = smov 0  }
   0x8   :  { %s1797_s19 = smov 0   ;;  %s1799_s20 = smov 0  }
   0x9 LB: > { %s1249_s21 = sadd.s32 4294967295, %s1755_s20   ;;  %s1250_s22 = sadd.s32 4294967294, %s1755_s20   ;;  %s1755_s20 = sphi %s1799_s20, %s21_s20   ;;  %s1751_s19 = sphi %s1797_s19, %s2136_s19   ;;  %s1747_s18 = sphi %s1795_s18, %s2135_s18   ;;  %s1743_s17 = sphi %s1793_s17, %s2134_s17   ;;  %s1739_s16 = sphi %s1791_s16, %s2133_s16   ;;  %s1735_s15 = sphi %s1789_s15, %s2132_s15  }
   0xa   : > { %p62_p0 = scmp.ne.s32.totalorder %s1739_s16, %s1735_s15  ;;  %p1823_p1 = scmp.eq.s32.totalorder %s1249_s21, 0 }
   0xb   : > { %p1827_p2 = scmp.eq.s32.totalorder %s1249_s21, 7  ;;  %p174_p3 = scmp.eq.s32.totalorder %s1250_s22, 7 }
   0xc   : > { %p1833_p4 = por %p1823_p1, %p62_p0  ;;  %p1251_p5 = scmp.ge.s32.totalorder %s1755_s20, 1 }
   0xd   : > { %p1838_p6 = por %p174_p3, %p62_p0  ;;  %p181_p7 = scmp.lt.s32.totalorder %s1755_s20, 9 }
   0xe   : > { %s2126_s1 = sld [smem:[#allocation13_spill]]  ;;  %s1757_s5 = smov [#allocation6]  }
   0xf   : > { %p1846_p8 = pnand %p1251_p5, %p181_p7  ;;  %s198_s6 = sshll.u32 %s1757_s5, 4  ;;  %s199_s6 = int_to_ptr.vmem [resolvable:$true] %s198_s6 }
  0x10   : > { %s1758_s7 = smov 64   ;;  %s1759_s8 = smov 4  }
  0x11   : > { %p1536_p9 = pneg %p1846_p8  ;;  %s40_s9 = sadd.s32 1, %s1751_s19 }
  0x12   : > { %p42_p11 = scmp.ge.s32.totalorder %s40_s9, 8  ;;  %s49_s10 = sadd.s32 1, %s1743_s17 }
  0x13   : > { %p1537_p10 = pnand %p1536_p9, %p1823_p1  ;;  %p56_p12 = scmp.ne.s32.totalorder %s1743_s17, %s1739_s16 }
  0x14   : > { %s196_s29 = sshll.u32 %s2126_s1, 4  ;;  %p57_p13 = scmp.eq.s32.totalorder %s1755_s20, 0  ;;  %s197_s29 = int_to_ptr.hbm [resolvable:$true] %s196_s29 }
  0x15   : > { %1539 = dma.hbm_to_vmem [thread:$0]  (!%p1537_p10), %s197_s29, 2048, %s199_s6, [#allocation7], %s1758_s7, %s1758_s7, %s1759_s8  }
  0x16   : > { %s2138_s9 = smov (%p42_p11, %s40_s9), 0  ;;  %p1861_p0 = por %p57_p13, %p56_p12 }
  0x17   : > { %2128 = sst [smem:[#allocation12_spill]] %s2138_s9  ;;  %p1867_p3 = por %p1827_p2, %p56_p12 }
  0x18   : > { %s44_s13 = ssub.s32 %s1751_s19, %s2138_s9  ;;  %p1549_p5 = scmp.lt.s32.totalorder %s1755_s20, 8 }
  0x19   : > { %p47_p7 = scmp.eq.s32.totalorder %s44_s13, 0  ;;  %s224_s14 = sand.u32 1, %s1743_s17  }
  0x1a   : > { %s1256_s21 = sshll.u32 %s224_s14, 8  ;;  %s1462_s27 = sshll.u32 %s1751_s19, 8 }
  0x1b   : > { %s1876_s22 = scalar_select %p47_p7, %s1743_s17, %s49_s10  }
  0x1c   : > { %s236_s5 = scalar_lea.hbm %s2115_s0, %s1462_s27  ;;  %s228_s6 = scalar_lea.vmem [#allocation3], %s1256_s21 }
  0x1d   : > { %s239_s7 = sshll.u32 %s228_s6, 4  ;;  %s237_s24 = sshll.u32 %s236_s5, 4  ;;  %s240_s7 = int_to_ptr.vmem [resolvable:$true] %s239_s7  ;;  %s238_s24 = int_to_ptr.hbm [resolvable:$true] %s237_s24 }
  0x1e   : > { %p1541_p2 = pnand %p1549_p5, %p1861_p0  ;;  %s225_s8 = scalar_lea.sflag [#allocation4], %s224_s14 }
  0x1f   : > { %s1760_s1 = smov 128   ;;  %s1761_s9 = smov 8  }
  0x20   : > { %1543 = dma.hbm_to_vmem [thread:$0]  (!%p1541_p2), %s238_s24, 4096, %s240_s7, %s225_s8, %s1760_s1, %s1760_s1, %s1761_s9  }
  0x21   : > { %251 = sbr.rel (%p1846_p8) target bundleno = 338 (0x152), region = 36  ;;  %s1887_s10 = sand.u32 (!%p1846_p8), 1, %s1739_s16  }
  0x22   : > { %s1261_s13 = sshll.u32 (!%p1846_p8), %s1887_s10, 8  ;;  %s254_s21 = scalar_lea.sflag (!%p1846_p8), [#allocation4], %s1887_s10 }
  0x23   : > { %s1893_s27 = scalar_lea.vmem (!%p1846_p8), [#allocation3], %s1261_s13 }
  0x26   : > { %1722 = dma.done.wait (%p1833_p4), %s254_s21, 4096  }
  0x27   : > { %1724 = vsyncadd (%p1833_p4), %s254_s21, 4294963200 }
  0x28   : > { %1726 = dma.done.wait (%p1823_p1), [#allocation7], 2048  }
  0x29   : > { %1728 = vsyncadd (%p1823_p1), [#allocation7], 4294965248  ;;  %v1502_v0 = vld [vmem:[#allocation6 + $0x38] sm:$0xff]  ;;  %v1501_v2 = vld [vmem:[#allocation6 + $0x30] sm:$0xff]  ;;  %s1981_s9 = scalar_lea.vmem [#allocation8], %s1261_s13  ;;  %s1511_s11 = sshll.u32 %s1747_s18, 8 }
  0x2a   : > { %v1510_v1 = vld [vmem:[#allocation6 + $0x78] sm:$0xff]  ;;  %692 = vmatpush.bf16.msra.mxu0 %v1502_v0  ;;  %1512 = vmatpush.bf16.msra.mxu2 %v1502_v0  ;;  %v1509_v3 = vld [vmem:[#allocation6 + $0x70] sm:$0xff]  ;;  %v1500_v4 = vld [vmem:[#allocation6 + $0x28] sm:$0xff]  ;;  %s1118_s29 = scalar_lea.hbm %s2119_s4, %s1511_s11  ;;  %s1119_s5 = sshll.u32 %s1981_s9, 4  ;;  %s1120_s5 = int_to_ptr.vmem [resolvable:$true] %s1119_s5 }
  0x2b   : > { %781 = vmatpush.bf16.msra.mxu1 %v1510_v1  ;;  %1520 = vmatpush.bf16.msra.mxu3 %v1510_v1  ;;  %v1508_v5 = vld [vmem:[#allocation6 + $0x68] sm:$0xff]  ;;  %v1499_v6 = vld [vmem:[#allocation6 + $0x20] sm:$0xff]  ;;  %v1498_v8 = vld [vmem:[#allocation6 + $0x18] sm:$0xff]  ;;  %s1121_s18 = sshll.u32 %s1118_s29, 4  ;;  %s1106_s6 = scalar_lea.sflag [#allocation5], %s1887_s10  ;;  %s1122_s18 = int_to_ptr.hbm [resolvable:$true] %s1121_s18 }
  0x2c   : > { %v1507_v7 = vld [vmem:[#allocation6 + $0x60] sm:$0xff]  ;;  %v1506_v9 = vld [vmem:[#allocation6 + $0x58] sm:$0xff]  ;;  %v1497_v10 = vld [vmem:[#allocation6 + $0x10] sm:$0xff]  ;;  %s1683_s7 = sshra.s32 %s1122_s18, 4  ;;  %s1689_s21 = scalar_lea.hbm %s2119_s4, 2048  ;;  %s1684_s7 = int_to_ptr.hbm [resolvable:$true] %s1683_s7 }
  0x2d   : > { %v1505_v11 = vld [vmem:[#allocation6 + $0x50] sm:$0xff]  ;;  %v1496_v12 = vld [vmem:[#allocation6 + $0x8] sm:$0xff]  ;;  %v1495_v14 = vld [vmem:[#allocation6] sm:$0xff]  ;;  %s1685_s24 = scalar_lea.hbm %s1684_s7, 256  ;;  %p1690_p9 = scmp.lt.s32.totalorder %s1684_s7, %s2119_s4 }
  0x2e   : > { %693 = vmatpush.bf16.msra.mxu0 %v1501_v2  ;;  %1513 = vmatpush.bf16.msra.mxu2 %v1501_v2  ;;  %v1504_v13 = vld [vmem:[#allocation6 + $0x48] sm:$0xff]  ;;  %v1503_v15 = vld [vmem:[#allocation6 + $0x40] sm:$0xff]  ;;  %v1274_v28 = vld [vmem:[%s1893_s27 + $0x10] sm:$0xf]  ;;  %p1686_p1 = scmp.ne.s32.totalorder %s1684_s7, %s1685_s24  ;;  %p1691_p10 = scmp.lt.s32.totalorder %s1689_s21, %s1685_s24 }
  0x2f   : > { %782 = vmatpush.bf16.msra.mxu1 %v1509_v3  ;;  %1521 = vmatpush.bf16.msra.mxu3 %v1509_v3  ;;  %v1266_v16 = vld [vmem:[%s1893_s27] sm:$0xf]  ;;  %v1464_v17 = vld [vmem:[%s1893_s27 + $0x4] sm:$0xf0]  ;;  %v1463_v20 = vld [vmem:[%s1893_s27 + $0x4] sm:$0xf] }
  0x30   : > { %v1330_v18 = vld [vmem:[%s1893_s27 + $0x80] sm:$0xf]  ;;  %v1480_v19 = vld [vmem:[%s1893_s27 + $0x84] sm:$0xf0]  ;;  %v1268_v21 = vld [vmem:[%s1893_s27 + $0x8] sm:$0xf0]  ;;  %v1267_v24 = vor.u32 %v1464_v17, %v1266_v16  ;;  %p1687_p4 = pnand %p1686_p1, %p1867_p3  ;;  %p1692_p11 = por %p1691_p10, %p1690_p9 }
  0x31   : > { %v1479_v22 = vld [vmem:[%s1893_s27 + $0x84] sm:$0xf]  ;;  %v1332_v23 = vld [vmem:[%s1893_s27 + $0x88] sm:$0xf0]  ;;  %v1331_v25 = vor.u32 %v1480_v19, %v1330_v18  ;;  %v1271_v26 = vor.u32 %v1463_v20, %v1268_v21  ;;  %v1466_v29 = vld [vmem:[%s1893_s27 + $0x14] sm:$0xf0] }
  0x32   : > { %694 = vmatpush.bf16.msra.mxu0 %v1500_v4  ;;  %1514 = vmatpush.bf16.msra.mxu2 %v1500_v4  ;;  %v1335_v27 = vor.u32 %v1479_v22, %v1332_v23  ;;  %v1338_v30 = vld [vmem:[%s1893_s27 + $0x90] sm:$0xf]  ;;  %v1482_v31 = vld [vmem:[%s1893_s27 + $0x94] sm:$0xf0]  ;;  %v1465_v32 = vld [vmem:[%s1893_s27 + $0x14] sm:$0xf]  ;;  %v1275_v36 = vor.u32 %v1466_v29, %v1274_v28  ;;  %p1688_p8 = pneg %p1687_p4 }
  0x33   : > { %783 = vmatpush.bf16.msra.mxu1 %v1508_v5  ;;  %1522 = vmatpush.bf16.msra.mxu3 %v1508_v5  ;;  %v1276_v33 = vld [vmem:[%s1893_s27 + $0x18] sm:$0xf0]  ;;  %v1481_v34 = vld [vmem:[%s1893_s27 + $0x94] sm:$0xf]  ;;  %v1339_v37 = vor.u32 %v1482_v31, %v1338_v30  ;;  %v1282_v40 = vld [vmem:[%s1893_s27 + $0x20] sm:$0xf] }
  0x34   : > { %v1340_v35 = vld [vmem:[%s1893_s27 + $0x98] sm:$0xf0]  ;;  %v1279_v38 = vor.u32 %v1465_v32, %v1276_v33  ;;  %v1468_v41 = vld [vmem:[%s1893_s27 + $0x24] sm:$0xf0]  ;;  %v1346_v42 = vld [vmem:[%s1893_s27 + $0xa0] sm:$0xf]  ;;  %p1693_p12 = pnand %p1692_p11, %p1688_p8 }
  0x35   : > { %v1343_v39 = vor.u32 %v1481_v34, %v1340_v35  ;;  %v1484_v43 = vld [vmem:[%s1893_s27 + $0xa4] sm:$0xf0]  ;;  %v1467_v44 = vld [vmem:[%s1893_s27 + $0x24] sm:$0xf]  ;;  %v1284_v45 = vld [vmem:[%s1893_s27 + $0x28] sm:$0xf0]  ;;  %v1283_v48 = vor.u32 %v1468_v41, %v1282_v40 }
  0x36   : > { %695 = vmatpush.bf16.msra.mxu0 %v1499_v6  ;;  %1515 = vmatpush.bf16.msra.mxu2 %v1499_v6  ;;  %v1483_v46 = vld [vmem:[%s1893_s27 + $0xa4] sm:$0xf]  ;;  %v1348_v47 = vld [vmem:[%s1893_s27 + $0xa8] sm:$0xf0]  ;;  %v1347_v49 = vor.u32 %v1484_v43, %v1346_v42  ;;  %v1287_v50 = vor.u32 %v1467_v44, %v1284_v45  ;;  %v1290_v52 = vld [vmem:[%s1893_s27 + $0x30] sm:$0xf] }
  0x37   : > { %784 = vmatpush.bf16.msra.mxu1 %v1507_v7  ;;  %1523 = vmatpush.bf16.msra.mxu3 %v1507_v7  ;;  %v1351_v51 = vor.u32 %v1483_v46, %v1348_v47  ;;  %v1470_v53 = vld [vmem:[%s1893_s27 + $0x34] sm:$0xf0]  ;;  %v1354_v54 = vld [vmem:[%s1893_s27 + $0xb0] sm:$0xf]  ;;  %v1469_v56 = vld [vmem:[%s1893_s27 + $0x34] sm:$0xf] }
  0x38   : > { %v1486_v55 = vld [vmem:[%s1893_s27 + $0xb4] sm:$0xf0]  ;;  %v1292_v57 = vld [vmem:[%s1893_s27 + $0x38] sm:$0xf0]  ;;  %v1485_v58 = vld [vmem:[%s1893_s27 + $0xb4] sm:$0xf]  ;;  %v1291_v60 = vor.u32 %v1470_v53, %v1290_v52 }
  0x39   : > { %v1356_v59 = vld [vmem:[%s1893_s27 + $0xb8] sm:$0xf0]  ;;  %v1355_v61 = vor.u32 %v1486_v55, %v1354_v54  ;;  %v1295_v62 = vor.u32 %v1469_v56, %v1292_v57  ;;  %v1298_v0 = vld [vmem:[%s1893_s27 + $0x40] sm:$0xf]  ;;  %v1472_v1 = vld [vmem:[%s1893_s27 + $0x44] sm:$0xf0] }
  0x3a   : > { %696 = vmatpush.bf16.msra.mxu0 %v1498_v8  ;;  %1516 = vmatpush.bf16.msra.mxu2 %v1498_v8  ;;  %v1359_v63 = vor.u32 %v1485_v58, %v1356_v59  ;;  %v1362_v2 = vld [vmem:[%s1893_s27 + $0xc0] sm:$0xf]  ;;  %v1488_v3 = vld [vmem:[%s1893_s27 + $0xc4] sm:$0xf0]  ;;  %v1471_v4 = vld [vmem:[%s1893_s27 + $0x44] sm:$0xf]  ;;  %v1299_v8 = vor.u32 %v1472_v1, %v1298_v0 }
  0x3b   : > { %785 = vmatpush.bf16.msra.mxu1 %v1506_v9  ;;  %1524 = vmatpush.bf16.msra.mxu3 %v1506_v9  ;;  %v1300_v5 = vld [vmem:[%s1893_s27 + $0x48] sm:$0xf0]  ;;  %v1487_v6 = vld [vmem:[%s1893_s27 + $0xc4] sm:$0xf]  ;;  %v1363_v9 = vor.u32 %v1488_v3, %v1362_v2  ;;  %v1473_v16 = vld [vmem:[%s1893_s27 + $0x54] sm:$0xf] }
  0x3c   : > { %v1364_v7 = vld [vmem:[%s1893_s27 + $0xc8] sm:$0xf0]  ;;  %v1308_v17 = vld [vmem:[%s1893_s27 + $0x58] sm:$0xf0]  ;;  %v1489_v18 = vld [vmem:[%s1893_s27 + $0xd4] sm:$0xf] }
  0x3d   : > { %v1372_v19 = vld [vmem:[%s1893_s27 + $0xd8] sm:$0xf0]  ;;  %v1311_v22 = vor.u32 %v1473_v16, %v1308_v17  ;;  %v1475_v28 = vld [vmem:[%s1893_s27 + $0x64] sm:$0xf]  ;;  %v1316_v29 = vld [vmem:[%s1893_s27 + $0x68] sm:$0xf0] }
  0x3e   : > { %697 = vmatpush.bf16.msra.mxu0 %v1497_v10  ;;  %1517 = vmatpush.bf16.msra.mxu2 %v1497_v10  ;;  %v1303_v10 = vor.u32 %v1471_v4, %v1300_v5  ;;  %v1375_v23 = vor.u32 %v1489_v18, %v1372_v19  ;;  %v1491_v30 = vld [vmem:[%s1893_s27 + $0xe4] sm:$0xf]  ;;  %v1380_v31 = vld [vmem:[%s1893_s27 + $0xe8] sm:$0xf0]  ;;  %v1319_v34 = vor.u32 %v1475_v28, %v1316_v29  ;;  %v1477_v40 = vld [vmem:[%s1893_s27 + $0x74] sm:$0xf] }
  0x3f   : > { %786 = vmatpush.bf16.msra.mxu1 %v1505_v11  ;;  %1525 = vmatpush.bf16.msra.mxu3 %v1505_v11  ;;  %v1367_v11 = vor.u32 %v1487_v6, %v1364_v7  ;;  %v1383_v35 = vor.u32 %v1491_v30, %v1380_v31  ;;  %v1324_v41 = vld [vmem:[%s1893_s27 + $0x78] sm:$0xf0]  ;;  %v1493_v42 = vld [vmem:[%s1893_s27 + $0xf4] sm:$0xf]  ;;  %v1975_v52 = vld [vmem:[%s2118_s3] ss:$0 sm:$0xff] }
  0x40   : > { %v1388_v43 = vld [vmem:[%s1893_s27 + $0xf8] sm:$0xf0]  ;;  %v1327_v46 = vor.u32 %v1477_v40, %v1324_v41 }
  0x41   : > { %v1391_v47 = vor.u32 %v1493_v42, %v1388_v43 }
  0x42   : > { %698 = vmatpush.bf16.msra.mxu0 %v1496_v12  ;;  %1518 = vmatpush.bf16.msra.mxu2 %v1496_v12  ;;  %v1306_v12 = vld [vmem:[%s1893_s27 + $0x50] sm:$0xf] }
  0x43   : > { %787 = vmatpush.bf16.msra.mxu1 %v1504_v13  ;;  %1526 = vmatpush.bf16.msra.mxu3 %v1504_v13  ;;  %v1474_v13 = vld [vmem:[%s1893_s27 + $0x54] sm:$0xf0] }
  0x44   : > { %v1307_v20 = vor.u32 %v1474_v13, %v1306_v12 }
  0x46   : > { %699 = vmatpush.bf16.msra.mxu0 %v1495_v14  ;;  %1519 = vmatpush.bf16.msra.mxu2 %v1495_v14  ;;  %v1370_v14 = vld [vmem:[%s1893_s27 + $0xd0] sm:$0xf] }
  0x47   : > { %788 = vmatpush.bf16.msra.mxu1 %v1503_v15  ;;  %1527 = vmatpush.bf16.msra.mxu3 %v1503_v15  ;;  %v1490_v15 = vld [vmem:[%s1893_s27 + $0xd4] sm:$0xf0] }
  0x48   : > { %v1371_v21 = vor.u32 %v1490_v15, %v1370_v14 }
  0x49   : > { %700 = vmatmul.bf16.vlgmr.msra.gmra.mxu0 %v1267_v24  ;;  %740 = vmatmul.bf16.vlgmr.msra.gmra.mxu2 %v1331_v25  ;;  %v1314_v24 = vld [vmem:[%s1893_s27 + $0x60] sm:$0xf]  ;;  %v1476_v25 = vld [vmem:[%s1893_s27 + $0x64] sm:$0xf0] }
  0x4a   : > { %789 = vmatmul.bf16.vlgmr.msra.gmra.mxu1 %v1271_v26  ;;  %829 = vmatmul.bf16.vlgmr.msra.gmra.mxu3 %v1335_v27  ;;  %v1378_v26 = vld [vmem:[%s1893_s27 + $0xe0] sm:$0xf]  ;;  %v1492_v27 = vld [vmem:[%s1893_s27 + $0xe4] sm:$0xf0]  ;;  %v1315_v32 = vor.u32 %v1476_v25, %v1314_v24 }
  0x4b   : > { %v1379_v33 = vor.u32 %v1492_v27, %v1378_v26 }
  0x59   : > { %705 = vmatmul.bf16.gmra.mxu0 %v1275_v36  ;;  %745 = vmatmul.bf16.gmra.mxu2 %v1339_v37  ;;  %v1322_v36 = vld [vmem:[%s1893_s27 + $0x70] sm:$0xf]  ;;  %v1478_v37 = vld [vmem:[%s1893_s27 + $0x74] sm:$0xf0] }
  0x5a   : > { %794 = vmatmul.bf16.gmra.mxu1 %v1279_v38  ;;  %834 = vmatmul.bf16.gmra.mxu3 %v1343_v39  ;;  %v1386_v38 = vld [vmem:[%s1893_s27 + $0xf0] sm:$0xf]  ;;  %v1494_v39 = vld [vmem:[%s1893_s27 + $0xf4] sm:$0xf0]  ;;  %v1323_v44 = vor.u32 %v1478_v37, %v1322_v36 }
  0x5b   : > { %v1387_v45 = vor.u32 %v1494_v39, %v1386_v38 }
  0x69   : > { %710 = vmatmul.bf16.gmra.mxu0 %v1283_v48  ;;  %750 = vmatmul.bf16.gmra.mxu2 %v1347_v49  ;;  %v1970_v49 = vld [vmem:[%s2117_s2] ss:$0 sm:$0xff] }
  0x6a   : > { %799 = vmatmul.bf16.gmra.mxu1 %v1287_v50  ;;  %839 = vmatmul.bf16.gmra.mxu3 %v1351_v51 }
  0x79   : > { %715 = vmatmul.bf16.gmra.mxu0 %v1291_v60  ;;  %755 = vmatmul.bf16.gmra.mxu2 %v1355_v61 }
  0x7a   : > { %804 = vmatmul.bf16.gmra.mxu1 %v1295_v62  ;;  %844 = vmatmul.bf16.gmra.mxu3 %v1359_v63 }
  0x89   : > { %720 = vmatmul.bf16.gmra.mxu0 %v1299_v8  ;;  %760 = vmatmul.bf16.gmra.mxu2 %v1363_v9 }
  0x8a   : > { %809 = vmatmul.bf16.gmra.mxu1 %v1303_v10  ;;  %849 = vmatmul.bf16.gmra.mxu3 %v1367_v11 }
  0x99   : > { %725 = vmatmul.bf16.gmra.mxu0 %v1307_v20  ;;  %765 = vmatmul.bf16.gmra.mxu2 %v1371_v21 }
  0x9a   : > { %814 = vmatmul.bf16.gmra.mxu1 %v1311_v22  ;;  %854 = vmatmul.bf16.gmra.mxu3 %v1375_v23 }
  0xa9   : > { %730 = vmatmul.bf16.gmra.mxu0 %v1315_v32  ;;  %770 = vmatmul.bf16.gmra.mxu2 %v1379_v33 }
  0xaa   : > { %819 = vmatmul.bf16.gmra.mxu1 %v1319_v34  ;;  %859 = vmatmul.bf16.gmra.mxu3 %v1383_v35 }
  0xb9   : > { %735 = vmatmul.bf16.gmra.mxu0 %v1323_v44  ;;  %775 = vmatmul.bf16.gmra.mxu2 %v1387_v45 }
  0xba   : > { %824 = vmatmul.bf16.gmra.mxu1 %v1327_v46  ;;  %864 = vmatmul.bf16.gmra.mxu3 %v1391_v47 }
  0xc6   : > { %v701_v48 = vpop.f32.mrf.mxu0 }
  0xc7   : > { %v790_v50 = vpop.f32.mrf.mxu1 }
  0xc8   : > { %v791_v51 = vadd.f32 %v790_v50, %v701_v48 }
  0xca   : > { %v973_v53 = vmul.f32 %v1970_v49, %v791_v51 }
  0xcc   : > { %v1009_v54 = vadd.f32 %v1975_v52, %v973_v53  ;;  %v741_v55 = vpop.f32.mrf.mxu2 }
  0xcd   : > { %v830_v56 = vpop.f32.mrf.mxu3 }
  0xce   : > { %v1041_v57 = vmax.f32 %v1009_v54, 0.0  ;;  %v831_v58 = vadd.f32 %v830_v56, %v741_v55  ;;  %v703_v59 = vpop.f32.mrf.mxu0 }
  0xcf   : > { %v792_v60 = vpop.f32.mrf.mxu1 }
  0xd0   : > { %1073 = vst [vmem:[%s1981_s9] sm:$0xff] %v1041_v57  ;;  %v989_v61 = vmul.f32 %v1970_v49, %v831_v58  ;;  %v793_v62 = vadd.f32 %v792_v60, %v703_v59 }
  0xd2   : > { %v1025_v63 = vadd.f32 %v1975_v52, %v989_v61  ;;  %v974_v0 = vmul.f32 %v1970_v49, %v793_v62 }
  0xd4   : > { %v1057_v1 = vmax.f32 %v1025_v63, 0.0  ;;  %v1010_v2 = vadd.f32 %v1975_v52, %v974_v0  ;;  %v743_v3 = vpop.f32.mrf.mxu2 }
  0xd5   : > { %v832_v4 = vpop.f32.mrf.mxu3 }
  0xd6   : > { %1089 = vst [vmem:[%s1981_s9 + $0x80] sm:$0xff] %v1057_v1  ;;  %v1042_v5 = vmax.f32 %v1010_v2, 0.0  ;;  %v833_v6 = vadd.f32 %v832_v4, %v743_v3  ;;  %v706_v7 = vpop.f32.mrf.mxu0 }
  0xd7   : > { %v795_v8 = vpop.f32.mrf.mxu1 }
  0xd8   : > { %1074 = vst [vmem:[%s1981_s9 + $0x8] sm:$0xff] %v1042_v5  ;;  %v990_v9 = vmul.f32 %v1970_v49, %v833_v6  ;;  %v796_v10 = vadd.f32 %v795_v8, %v706_v7 }
  0xda   : > { %v1026_v11 = vadd.f32 %v1975_v52, %v990_v9  ;;  %v975_v12 = vmul.f32 %v1970_v49, %v796_v10 }
  0xdc   : > { %v1058_v13 = vmax.f32 %v1026_v11, 0.0  ;;  %v1011_v14 = vadd.f32 %v1975_v52, %v975_v12  ;;  %v746_v15 = vpop.f32.mrf.mxu2 }
  0xdd   : > { %v835_v16 = vpop.f32.mrf.mxu3 }
  0xde   : > { %1090 = vst [vmem:[%s1981_s9 + $0x88] sm:$0xff] %v1058_v13  ;;  %v1043_v17 = vmax.f32 %v1011_v14, 0.0  ;;  %v836_v18 = vadd.f32 %v835_v16, %v746_v15  ;;  %v708_v19 = vpop.f32.mrf.mxu0 }
  0xdf   : > { %v797_v20 = vpop.f32.mrf.mxu1 }
  0xe0   : > { %1075 = vst [vmem:[%s1981_s9 + $0x10] sm:$0xff] %v1043_v17  ;;  %v991_v21 = vmul.f32 %v1970_v49, %v836_v18  ;;  %v798_v22 = vadd.f32 %v797_v20, %v708_v19 }
  0xe2   : > { %v1027_v23 = vadd.f32 %v1975_v52, %v991_v21  ;;  %v976_v24 = vmul.f32 %v1970_v49, %v798_v22 }
  0xe4   : > { %v1059_v25 = vmax.f32 %v1027_v23, 0.0  ;;  %v1012_v26 = vadd.f32 %v1975_v52, %v976_v24  ;;  %v748_v27 = vpop.f32.mrf.mxu2 }
  0xe5   : > { %v837_v28 = vpop.f32.mrf.mxu3 }
  0xe6   : > { %1091 = vst [vmem:[%s1981_s9 + $0x90] sm:$0xff] %v1059_v25  ;;  %v1044_v29 = vmax.f32 %v1012_v26, 0.0  ;;  %v838_v30 = vadd.f32 %v837_v28, %v748_v27  ;;  %v711_v31 = vpop.f32.mrf.mxu0 }
  0xe7   : > { %v800_v32 = vpop.f32.mrf.mxu1 }
  0xe8   : > { %1076 = vst [vmem:[%s1981_s9 + $0x18] sm:$0xff] %v1044_v29  ;;  %v992_v33 = vmul.f32 %v1970_v49, %v838_v30  ;;  %v801_v34 = vadd.f32 %v800_v32, %v711_v31 }
  0xea   : > { %v1028_v35 = vadd.f32 %v1975_v52, %v992_v33  ;;  %v977_v36 = vmul.f32 %v1970_v49, %v801_v34 }
  0xec   : > { %v1060_v37 = vmax.f32 %v1028_v35, 0.0  ;;  %v1013_v38 = vadd.f32 %v1975_v52, %v977_v36  ;;  %v751_v39 = vpop.f32.mrf.mxu2 }
  0xed   : > { %v840_v40 = vpop.f32.mrf.mxu3 }
  0xee   : > { %1092 = vst [vmem:[%s1981_s9 + $0x98] sm:$0xff] %v1060_v37  ;;  %v1045_v41 = vmax.f32 %v1013_v38, 0.0  ;;  %v841_v42 = vadd.f32 %v840_v40, %v751_v39  ;;  %v713_v43 = vpop.f32.mrf.mxu0 }
  0xef   : > { %v802_v44 = vpop.f32.mrf.mxu1 }
  0xf0   : > { %1077 = vst [vmem:[%s1981_s9 + $0x20] sm:$0xff] %v1045_v41  ;;  %v993_v45 = vmul.f32 %v1970_v49, %v841_v42  ;;  %v803_v46 = vadd.f32 %v802_v44, %v713_v43 }
  0xf2   : > { %v1029_v47 = vadd.f32 %v1975_v52, %v993_v45  ;;  %v978_v48 = vmul.f32 %v1970_v49, %v803_v46 }
  0xf4   : > { %v1061_v50 = vmax.f32 %v1029_v47, 0.0  ;;  %v1014_v51 = vadd.f32 %v1975_v52, %v978_v48  ;;  %v753_v53 = vpop.f32.mrf.mxu2 }
  0xf5   : > { %v842_v54 = vpop.f32.mrf.mxu3 }
  0xf6   : > { %1093 = vst [vmem:[%s1981_s9 + $0xa0] sm:$0xff] %v1061_v50  ;;  %v1046_v55 = vmax.f32 %v1014_v51, 0.0  ;;  %v843_v56 = vadd.f32 %v842_v54, %v753_v53  ;;  %v716_v57 = vpop.f32.mrf.mxu0 }
  0xf7   : > { %v805_v58 = vpop.f32.mrf.mxu1 }
  0xf8   : > { %1078 = vst [vmem:[%s1981_s9 + $0x28] sm:$0xff] %v1046_v55  ;;  %v994_v59 = vmul.f32 %v1970_v49, %v843_v56  ;;  %v806_v60 = vadd.f32 %v805_v58, %v716_v57 }
  0xfa   : > { %v1030_v61 = vadd.f32 %v1975_v52, %v994_v59  ;;  %v979_v62 = vmul.f32 %v1970_v49, %v806_v60 }
  0xfc   : > { %v1062_v63 = vmax.f32 %v1030_v61, 0.0  ;;  %v1015_v0 = vadd.f32 %v1975_v52, %v979_v62  ;;  %v756_v1 = vpop.f32.mrf.mxu2 }
  0xfd   : > { %v845_v2 = vpop.f32.mrf.mxu3 }
  0xfe   : > { %1094 = vst [vmem:[%s1981_s9 + $0xa8] sm:$0xff] %v1062_v63  ;;  %v1047_v3 = vmax.f32 %v1015_v0, 0.0  ;;  %v846_v4 = vadd.f32 %v845_v2, %v756_v1  ;;  %v718_v5 = vpop.f32.mrf.mxu0 }
  0xff   : > { %v807_v6 = vpop.f32.mrf.mxu1 }
 0x100   : > { %1079 = vst [vmem:[%s1981_s9 + $0x30] sm:$0xff] %v1047_v3  ;;  %v995_v7 = vmul.f32 %v1970_v49, %v846_v4  ;;  %v808_v8 = vadd.f32 %v807_v6, %v718_v5 }
 0x102   : > { %v1031_v9 = vadd.f32 %v1975_v52, %v995_v7  ;;  %v980_v10 = vmul.f32 %v1970_v49, %v808_v8 }
 0x104   : > { %v1063_v11 = vmax.f32 %v1031_v9, 0.0  ;;  %v1016_v12 = vadd.f32 %v1975_v52, %v980_v10  ;;  %v758_v13 = vpop.f32.mrf.mxu2 }
 0x105   : > { %v847_v14 = vpop.f32.mrf.mxu3 }
 0x106   : > { %1095 = vst [vmem:[%s1981_s9 + $0xb0] sm:$0xff] %v1063_v11  ;;  %v1048_v15 = vmax.f32 %v1016_v12, 0.0  ;;  %v848_v16 = vadd.f32 %v847_v14, %v758_v13  ;;  %v721_v17 = vpop.f32.mrf.mxu0 }
 0x107   : > { %v810_v18 = vpop.f32.mrf.mxu1 }
 0x108   : > { %1080 = vst [vmem:[%s1981_s9 + $0x38] sm:$0xff] %v1048_v15  ;;  %v996_v19 = vmul.f32 %v1970_v49, %v848_v16  ;;  %v811_v20 = vadd.f32 %v810_v18, %v721_v17 }
 0x10a   : > { %v1032_v21 = vadd.f32 %v1975_v52, %v996_v19  ;;  %v981_v22 = vmul.f32 %v1970_v49, %v811_v20 }
 0x10c   : > { %v1064_v23 = vmax.f32 %v1032_v21, 0.0  ;;  %v1017_v24 = vadd.f32 %v1975_v52, %v981_v22  ;;  %v761_v25 = vpop.f32.mrf.mxu2 }
 0x10d   : > { %v850_v26 = vpop.f32.mrf.mxu3 }
 0x10e   : > { %1096 = vst [vmem:[%s1981_s9 + $0xb8] sm:$0xff] %v1064_v23  ;;  %v1049_v27 = vmax.f32 %v1017_v24, 0.0  ;;  %v851_v28 = vadd.f32 %v850_v26, %v761_v25  ;;  %v723_v29 = vpop.f32.mrf.mxu0 }
 0x10f   : > { %v812_v30 = vpop.f32.mrf.mxu1 }
 0x110   : > { %1081 = vst [vmem:[%s1981_s9 + $0x40] sm:$0xff] %v1049_v27  ;;  %v997_v31 = vmul.f32 %v1970_v49, %v851_v28  ;;  %v813_v32 = vadd.f32 %v812_v30, %v723_v29 }
 0x112   : > { %v1033_v33 = vadd.f32 %v1975_v52, %v997_v31  ;;  %v982_v34 = vmul.f32 %v1970_v49, %v813_v32 }
 0x114   : > { %v1065_v35 = vmax.f32 %v1033_v33, 0.0  ;;  %v1018_v36 = vadd.f32 %v1975_v52, %v982_v34  ;;  %v763_v37 = vpop.f32.mrf.mxu2 }
 0x115   : > { %v852_v38 = vpop.f32.mrf.mxu3 }
 0x116   : > { %1097 = vst [vmem:[%s1981_s9 + $0xc0] sm:$0xff] %v1065_v35  ;;  %v1050_v39 = vmax.f32 %v1018_v36, 0.0  ;;  %v853_v40 = vadd.f32 %v852_v38, %v763_v37  ;;  %v726_v41 = vpop.f32.mrf.mxu0 }
 0x117   : > { %v815_v42 = vpop.f32.mrf.mxu1 }
 0x118   : > { %1082 = vst [vmem:[%s1981_s9 + $0x48] sm:$0xff] %v1050_v39  ;;  %v998_v43 = vmul.f32 %v1970_v49, %v853_v40  ;;  %v816_v44 = vadd.f32 %v815_v42, %v726_v41 }
 0x11a   : > { %v1034_v45 = vadd.f32 %v1975_v52, %v998_v43  ;;  %v983_v46 = vmul.f32 %v1970_v49, %v816_v44 }
 0x11c   : > { %v1066_v47 = vmax.f32 %v1034_v45, 0.0  ;;  %v1019_v48 = vadd.f32 %v1975_v52, %v983_v46  ;;  %v766_v50 = vpop.f32.mrf.mxu2 }
 0x11d   : > { %v855_v51 = vpop.f32.mrf.mxu3 }
 0x11e   : > { %1098 = vst [vmem:[%s1981_s9 + $0xc8] sm:$0xff] %v1066_v47  ;;  %v1051_v53 = vmax.f32 %v1019_v48, 0.0  ;;  %v856_v54 = vadd.f32 %v855_v51, %v766_v50  ;;  %v728_v55 = vpop.f32.mrf.mxu0 }
 0x11f   : > { %v817_v56 = vpop.f32.mrf.mxu1 }
 0x120   : > { %1083 = vst [vmem:[%s1981_s9 + $0x50] sm:$0xff] %v1051_v53  ;;  %v999_v57 = vmul.f32 %v1970_v49, %v856_v54  ;;  %v818_v58 = vadd.f32 %v817_v56, %v728_v55 }
 0x122   : > { %v1035_v59 = vadd.f32 %v1975_v52, %v999_v57  ;;  %v984_v60 = vmul.f32 %v1970_v49, %v818_v58 }
 0x124   : > { %v1067_v61 = vmax.f32 %v1035_v59, 0.0  ;;  %v1020_v62 = vadd.f32 %v1975_v52, %v984_v60  ;;  %v768_v63 = vpop.f32.mrf.mxu2 }
 0x125   : > { %v857_v0 = vpop.f32.mrf.mxu3 }
 0x126   : > { %1099 = vst [vmem:[%s1981_s9 + $0xd0] sm:$0xff] %v1067_v61  ;;  %v1052_v1 = vmax.f32 %v1020_v62, 0.0  ;;  %v858_v2 = vadd.f32 %v857_v0, %v768_v63  ;;  %v731_v3 = vpop.f32.mrf.mxu0 }
 0x127   : > { %v820_v4 = vpop.f32.mrf.mxu1 }
 0x128   : > { %1084 = vst [vmem:[%s1981_s9 + $0x58] sm:$0xff] %v1052_v1  ;;  %v1000_v5 = vmul.f32 %v1970_v49, %v858_v2  ;;  %v821_v6 = vadd.f32 %v820_v4, %v731_v3 }
 0x12a   : > { %v1036_v7 = vadd.f32 %v1975_v52, %v1000_v5  ;;  %v985_v8 = vmul.f32 %v1970_v49, %v821_v6 }
 0x12c   : > { %v1068_v9 = vmax.f32 %v1036_v7, 0.0  ;;  %v1021_v10 = vadd.f32 %v1975_v52, %v985_v8  ;;  %v771_v11 = vpop.f32.mrf.mxu2 }
 0x12d   : > { %v860_v12 = vpop.f32.mrf.mxu3 }
 0x12e   : > { %1100 = vst [vmem:[%s1981_s9 + $0xd8] sm:$0xff] %v1068_v9  ;;  %v1053_v13 = vmax.f32 %v1021_v10, 0.0  ;;  %v861_v14 = vadd.f32 %v860_v12, %v771_v11  ;;  %v733_v15 = vpop.f32.mrf.mxu0 }
 0x12f   : > { %v822_v16 = vpop.f32.mrf.mxu1 }
 0x130   : > { %1085 = vst [vmem:[%s1981_s9 + $0x60] sm:$0xff] %v1053_v13  ;;  %v1001_v17 = vmul.f32 %v1970_v49, %v861_v14  ;;  %v823_v18 = vadd.f32 %v822_v16, %v733_v15 }
 0x132   : > { %v1037_v19 = vadd.f32 %v1975_v52, %v1001_v17  ;;  %v986_v20 = vmul.f32 %v1970_v49, %v823_v18 }
 0x134   : > { %v1069_v21 = vmax.f32 %v1037_v19, 0.0  ;;  %v1022_v22 = vadd.f32 %v1975_v52, %v986_v20  ;;  %v773_v23 = vpop.f32.mrf.mxu2 }
 0x135   : > { %v862_v24 = vpop.f32.mrf.mxu3 }
 0x136   : > { %1101 = vst [vmem:[%s1981_s9 + $0xe0] sm:$0xff] %v1069_v21  ;;  %v1054_v25 = vmax.f32 %v1022_v22, 0.0  ;;  %v863_v26 = vadd.f32 %v862_v24, %v773_v23  ;;  %v736_v27 = vpop.f32.mrf.mxu0 }
 0x137   : > { %v825_v28 = vpop.f32.mrf.mxu1 }
 0x138   : > { %1086 = vst [vmem:[%s1981_s9 + $0x68] sm:$0xff] %v1054_v25  ;;  %v1002_v29 = vmul.f32 %v1970_v49, %v863_v26  ;;  %v826_v30 = vadd.f32 %v825_v28, %v736_v27 }
 0x13a   : > { %v1038_v31 = vadd.f32 %v1975_v52, %v1002_v29  ;;  %v987_v32 = vmul.f32 %v1970_v49, %v826_v30 }
 0x13c   : > { %v1070_v33 = vmax.f32 %v1038_v31, 0.0  ;;  %v1023_v34 = vadd.f32 %v1975_v52, %v987_v32  ;;  %v776_v35 = vpop.f32.mrf.mxu2 }
 0x13d   : > { %v865_v36 = vpop.f32.mrf.mxu3 }
 0x13e   : > { %1102 = vst [vmem:[%s1981_s9 + $0xe8] sm:$0xff] %v1070_v33  ;;  %v1055_v37 = vmax.f32 %v1023_v34, 0.0  ;;  %v866_v38 = vadd.f32 %v865_v36, %v776_v35  ;;  %v738_v39 = vpop.f32.mrf.mxu0 }
 0x13f   : > { %v827_v40 = vpop.f32.mrf.mxu1 }
 0x140   : > { %1087 = vst [vmem:[%s1981_s9 + $0x70] sm:$0xff] %v1055_v37  ;;  %v1003_v41 = vmul.f32 %v1970_v49, %v866_v38  ;;  %v828_v42 = vadd.f32 %v827_v40, %v738_v39 }
 0x142   : > { %v1039_v43 = vadd.f32 %v1975_v52, %v1003_v41  ;;  %v988_v44 = vmul.f32 %v1970_v49, %v828_v42 }
 0x144   : > { %v1071_v45 = vmax.f32 %v1039_v43, 0.0  ;;  %v1024_v46 = vadd.f32 %v1975_v52, %v988_v44  ;;  %v778_v47 = vpop.f32.mrf.mxu2 }
 0x145   : > { %v867_v48 = vpop.f32.mrf.mxu3 }
 0x146   : > { %1103 = vst [vmem:[%s1981_s9 + $0xf0] sm:$0xff] %v1071_v45  ;;  %v1056_v50 = vmax.f32 %v1024_v46, 0.0  ;;  %v868_v51 = vadd.f32 %v867_v48, %v778_v47 }
 0x148   : > { %1088 = vst [vmem:[%s1981_s9 + $0x78] sm:$0xff] %v1056_v50  ;;  %v1004_v53 = vmul.f32 %v1970_v49, %v868_v51 }
 0x14a   : > { %v1040_v54 = vadd.f32 %v1975_v52, %v1004_v53 }
 0x14c   : > { %v1072_v55 = vmax.f32 %v1040_v54, 0.0 }
 0x14e   : > { %1104 = vst [vmem:[%s1981_s9 + $0xf8] sm:$0xff] %v1072_v55 }
 0x14f   : > { %1696 = shalt.err (!%p1693_p12)
}
 0x150   : > { %s1762_s10 = smov 128   ;;  %s1763_s23 = smov 8  }
 0x151   : > { %1534 = dma.vmem_to_hbm [thread:$0]  (%p1867_p3), %s1120_s5, 4096, %s1122_s18, %s1106_s6, %s1762_s10, %s1762_s10, %s1763_s23  }
 0x152 PF: > { %p1551_p13 = scmp.ge.s32.totalorder %s1755_s20, 2  ;;  %s1136_s25 = sand.u32 1, %s1735_s15  }
 0x153   : > { %s1137_s30 = scalar_lea.sflag [#allocation5], %s1136_s25 }
 0x154   : > { %p1545_p0 = pnand %p1551_p13, %p1838_p6 }
 0x156   : > { %p1546_p5 = pneg %p1545_p0 }
 0x158   : > { %1730 = dma.done.wait (%p1546_p5), %s1137_s30, 4096  }
 0x159   : > { %1732 = vsyncadd (%p1546_p5), %s1137_s30, 4294963200  ;;  %s21_s20 = sadd.s32 1, %s1755_s20   ;;  %s2131_s12 = sld [smem:[#allocation12_spill]] }
 0x15a   : > { %p18_p7 = scmp.ge.s32.totalorder %s21_s20, 10   ;;  %s2132_s15 = smov %s1739_s16 }
 0x15b   : > { %s2133_s16 = smov %s1743_s17  ;;  %s2134_s17 = smov %s1876_s22 }
 0x15c   : > { %s2135_s18 = smov %s1751_s19  ;;  %20 = sbr.rel (!%p18_p7) target bundleno = 9 (0x9), region = 100 }
 0x15f   : > { %s2136_s19 = smov %s2131_s12 }
 0x161   :  { %1143 = vsyncpa [#allocation4], 1 }
 0x162   :  { %1145 = vsyncpa [#allocation4 + $0x1], 1 }
 0x163   :  { %1146 = vsyncpa [#allocation7], 1 }
 0x164   :  { %1147 = vsyncpa [#allocation5], 1 }
 0x165   :  { %1149 = vsyncpa [#allocation5 + $0x1], 1 }

</bundles_post_ra>
